<compile_context>
chip_gen: v6e
topology: v6e:2x2x1
jax: 0.10.0
libtpu: 0.0.40
codegen_flags: <defaults>
</compile_context>

<pallas_src>
import jax
import jax.numpy as jnp
from jax.experimental import pallas as pl
from jax.experimental.pallas import tpu as pltpu


_COMPUTE_DT = jnp.bfloat16          # MXU-native; uint8 pixel values exact in bf16
_VMEM_LIMIT_BYTES = 32 * 1024 * 1024   # > v5e 16MiB default, <= v7x 64MiB physical
_PLANE_VMEM_BUDGET = 16 * 1024 * 1024  # working-set budget used to size B
_MAX_PLANES_PER_STEP = 64              # cap static unroll of the per-plane loop


def _resize_norm_kernel(scale_ref, bias_ref, x_ref, wh_ref, wwT_ref, o_ref):
    # scale_ref/bias_ref : (N*C,) f32 in SMEM (scalar prefetch): 1/std, -mean/std
    # x_ref              : (B, H_in, W_in)   raw planes (uint8 or float)
    # wh_ref             : (H_out, H_in)     bf16 row-interp matrix
    # wwT_ref            : (W_in, W_out)     bf16 col-interp matrix (1/255 folded in)
    # o_ref              : (B, H_out, W_out) f32
    B, H_in, W_in = x_ref.shape
    step = pl.program_id(0)

    # In-kernel cast: uint8 -> f32 -> bf16 (input DMA stays 1 byte/pixel).
    x = x_ref[...].astype(jnp.float32).astype(_COMPUTE_DT)      # (B, H_in, W_in)
    wh = wh_ref[...]                                            # (H_out, H_in)
    wwT = wwT_ref[...]                                          # (W_in, W_out)

    # Column interpolation for all B planes as one big MXU matmul when the
    # leading-dim collapse is sublane-tile aligned; otherwise per-plane.
    flat = (H_in % 8 == 0) or (B == 1)
    if flat:
        t_all = jnp.dot(x.reshape(B * H_in, W_in), wwT,
                        preferred_element_type=jnp.float32)     # (B*H_in, W_out)
        t_all = t_all.astype(_COMPUTE_DT)

    for b in range(B):                                          # static unroll
        if flat:
            t_b = t_all[b * H_in:(b + 1) * H_in, :]             # (H_in, W_out)
        else:
            t_b = jnp.dot(x[b], wwT,
                          preferred_element_type=jnp.float32).astype(_COMPUTE_DT)
        # Row interpolation: (H_out, H_in) @ (H_in, W_out) -> (H_out, W_out)
        y_b = jnp.dot(wh, t_b, preferred_element_type=jnp.float32)
        sc = scale_ref[step * B + b]        # f32 scalar reads from SMEM (free)
        bi = bias_ref[step * B + b]
        o_ref[b] = y_b * sc + bi            # fused normalize: (y - m)/s


def _bilinear_matrix(out_size: int, in_size: int) -> jnp.ndarray:
    """PyTorch-style bilinear interp matrix, align_corners=False, antialias=False."""
    dst = jnp.arange(out_size, dtype=jnp.float32)
    scale = in_size / out_size
    src = (dst + 0.5) * scale - 0.5
    src = jnp.maximum(src, 0.0)  # PyTorch clamps negative source coords to 0
    i0 = jnp.clip(jnp.floor(src).astype(jnp.int32), 0, in_size - 1)
    i1 = jnp.minimum(i0 + 1, in_size - 1)
    lam = src - i0.astype(jnp.float32)
    rows = jnp.arange(out_size)
    w = jnp.zeros((out_size, in_size), jnp.float32)
    w = w.at[rows, i0].add(1.0 - lam)
    w = w.at[rows, i1].add(lam)
    return w


def _pick_plane_batch(nc, h_in, w_in, h_out, w_out, budget_bytes):
    """Largest divisor of nc whose per-step VMEM working set fits the budget."""
    per_plane = (2 * h_in * w_in              # u8 input, double-buffered
                 + 2 * h_out * w_out * 4      # f32 output, double-buffered
                 + h_in * w_in * 2            # bf16 cast of the input
                 + h_in * w_out * 6           # f32 + bf16 intermediate
                 + h_out * w_out * 4)         # f32 result before store
    b_max = max(1, min(_MAX_PLANES_PER_STEP, budget_bytes // per_plane))
    for cand in range(min(nc, b_max), 0, -1):
        if nc % cand == 0:
            return cand
    return 1


def resize_norm(x, size,
                mean=(0.485, 0.456, 0.406),
                std=(0.229, 0.224, 0.225)):
    """x: (N, C, H_in, W_in) uint8 (or float) -> (N, C, H_out, W_out) float32."""
    N, C, H_in, W_in = x.shape
    H_out, W_out = size
    assert C == len(mean) == len(std)
    NC = N * C

    # Free metadata reshape on the raw (uint8) HBM array; no dtype cast here.
    x_planes = x.reshape(NC, H_in, W_in)

    # Interp matrices in bf16; fold the /255 into the column matrix.
    wh = _bilinear_matrix(H_out, H_in).astype(_COMPUTE_DT)            # (H_out, H_in)
    wwT = (_bilinear_matrix(W_out, W_in) / 255.0).T.astype(_COMPUTE_DT)  # (W_in, W_out)

    # Per-plane affine folded from (mean, std): out = y * (1/std) + (-mean/std)
    mean_a = jnp.asarray(mean, jnp.float32)
    std_a = jnp.asarray(std, jnp.float32)
    scale = jnp.tile(1.0 / std_a, N)            # (N*C,)
    bias = jnp.tile(-mean_a / std_a, N)         # (N*C,)

    B = _pick_plane_batch(NC, H_in, W_in, H_out, W_out, _PLANE_VMEM_BUDGET)

    grid_spec = pltpu.PrefetchScalarGridSpec(
        num_scalar_prefetch=2,                  # scale, bias -> SMEM
        grid=(NC // B,),
        in_specs=[
            pl.BlockSpec((B, H_in, W_in), lambda i, sc, bi: (i, 0, 0)),   # planes
            pl.BlockSpec((H_out, H_in), lambda i, sc, bi: (0, 0)),        # Wh (resident)
            pl.BlockSpec((W_in, W_out), lambda i, sc, bi: (0, 0)),        # Ww^T (resident)
        ],
        out_specs=pl.BlockSpec((B, H_out, W_out), lambda i, sc, bi: (i, 0, 0)),
    )

    out = pl.pallas_call(
        _resize_norm_kernel,
        out_shape=jax.ShapeDtypeStruct((NC, H_out, W_out), jnp.float32),
        grid_spec=grid_spec,
        compiler_params=pltpu.CompilerParams(
            dimension_semantics=("parallel",),   # plane batches are independent (v7x 2 TCs)
            vmem_limit_bytes=_VMEM_LIMIT_BYTES,
        ),
    )(scale, bias, x_planes, wh, wwT)

    return out.reshape(N, C, H_out, W_out)


if __name__ == "__main__":
    key = jax.random.PRNGKey(0)
    # uint8 image-like input, NCHW, 3 channels (mean/std imply C=3)
    x = jax.random.randint(key, (2, 3, 16, 16), 0, 256, dtype=jnp.int32).astype(jnp.uint8)

    out = resize_norm(x, size=(12, 20))
    out = jax.block_until_ready(out)

    assert out.shape == (2, 3, 12, 20)
    assert out.dtype == jnp.float32
    assert bool(jnp.all(jnp.isfinite(out)))

    # Loose f32 reference check (kernel matmuls run in bf16).
    wh32 = _bilinear_matrix(12, 16)
    ww32 = _bilinear_matrix(20, 16)
    xf = x.astype(jnp.float32) / 255.0
    ref = jnp.einsum('oh,nchw,pw->ncop', wh32, xf, ww32)
    m = jnp.asarray((0.485, 0.456, 0.406), jnp.float32).reshape(1, 3, 1, 1)
    s = jnp.asarray((0.229, 0.224, 0.225), jnp.float32).reshape(1, 3, 1, 1)
    ref = (ref - m) / s
    err = float(jnp.max(jnp.abs(out - ref)))
    assert err < 0.2, f"max abs err too large: {err}"

    print("KERNEL_OK")
</pallas_src>

<mosaic_0001>
module attributes {stable_mosaic.version = 11 : i64} {
  func.func @_resize_norm_kernel(%arg0: i32, %arg1: memref<6xf32, #tpu.memory_space<smem>>, %arg2: memref<6xf32, #tpu.memory_space<smem>>, %arg3: memref<6x16x16xi8, #tpu.memory_space<vmem>>, %arg4: memref<12x16xbf16, #tpu.memory_space<vmem>>, %arg5: memref<16x20xbf16, #tpu.memory_space<vmem>>, %arg6: memref<6x12x20xf32, #tpu.memory_space<vmem>>) attributes {dimension_semantics = [#tpu.dimension_semantics<parallel>], iteration_bounds = array<i64: 1>, scalar_prefetch = 2 : i64, scratch_operands = 0 : i64, tpu.core_type = #tpu.core_type<tc>, window_params = [{transform_indices = @transform_0, window_bounds = array<i64: 6, 16, 16>}, {pipeline_mode = #tpu.pipeline_mode<synchronous>, transform_indices = @transform_1, window_bounds = array<i64: 12, 16>}, {pipeline_mode = #tpu.pipeline_mode<synchronous>, transform_indices = @transform_2, window_bounds = array<i64: 16, 20>}, {transform_indices = @transform_3, window_bounds = array<i64: 6, 12, 20>}]} {
    %c0 = arith.constant 0 : index
    %c0_0 = arith.constant 0 : index
    %c0_1 = arith.constant 0 : index
    %0 = vector.load %arg3[%c0, %c0_0, %c0_1] : memref<6x16x16xi8, #tpu.memory_space<vmem>>, vector<6x16x16xi8>
    %1 = arith.uitofp %0 : vector<6x16x16xi8> to vector<6x16x16xf32>
    %2 = arith.truncf %1 : vector<6x16x16xf32> to vector<6x16x16xbf16>
    %c0_2 = arith.constant 0 : index
    %c0_3 = arith.constant 0 : index
    %3 = vector.load %arg4[%c0_2, %c0_3] : memref<12x16xbf16, #tpu.memory_space<vmem>>, vector<12x16xbf16>
    %c0_4 = arith.constant 0 : index
    %c0_5 = arith.constant 0 : index
    %4 = vector.load %arg5[%c0_4, %c0_5] : memref<16x20xbf16, #tpu.memory_space<vmem>>, vector<16x20xbf16>
    %5 = vector.shape_cast %2 : vector<6x16x16xbf16> to vector<96x16xbf16>
    %cst = arith.constant dense<0.000000e+00> : vector<96x20xf32>
    %6 = tpu.matmul %5, %4, %cst {dimension_numbers = #tpu.dot_dimension_numbers<[1], [0], [0], [1], [0, 0, 1, 1], [], []>} : vector<96x16xbf16>, vector<16x20xbf16>, vector<96x20xf32> -> vector<96x20xf32>
    %7 = arith.truncf %6 : vector<96x20xf32> to vector<96x20xbf16>
    %8 = vector.extract_strided_slice %7 {offsets = [0, 0], sizes = [16, 20], strides = [1, 1]} : vector<96x20xbf16> to vector<16x20xbf16>
    %cst_6 = arith.constant dense<0.000000e+00> : vector<12x20xf32>
    %9 = tpu.matmul %3, %8, %cst_6 {dimension_numbers = #tpu.dot_dimension_numbers<[1], [0], [0], [1], [0, 0, 1, 1], [], []>} : vector<12x16xbf16>, vector<16x20xbf16>, vector<12x20xf32> -> vector<12x20xf32>
    %c6_i32 = arith.constant 6 : i32
    %10 = arith.muli %arg0, %c6_i32 : i32
    %c0_i32 = arith.constant 0 : i32
    %11 = arith.addi %10, %c0_i32 : i32
    %12 = arith.index_cast %11 : i32 to index
    %13 = memref.load %arg1[%12] : memref<6xf32, #tpu.memory_space<smem>>
    %c6_i32_7 = arith.constant 6 : i32
    %14 = arith.muli %arg0, %c6_i32_7 : i32
    %c0_i32_8 = arith.constant 0 : i32
    %15 = arith.addi %14, %c0_i32_8 : i32
    %16 = arith.index_cast %15 : i32 to index
    %17 = memref.load %arg2[%16] : memref<6xf32, #tpu.memory_space<smem>>
    %18 = vector.broadcast %13 : f32 to vector<12x20xf32>
    %19 = arith.mulf %9, %18 : vector<12x20xf32>
    %20 = vector.broadcast %17 : f32 to vector<12x20xf32>
    %21 = arith.addf %19, %20 : vector<12x20xf32>
    %c0_9 = arith.constant 0 : index
    %c0_10 = arith.constant 0 : index
    %c0_11 = arith.constant 0 : index
    %22 = vector.load %arg6[%c0_9, %c0_10, %c0_11] : memref<6x12x20xf32, #tpu.memory_space<vmem>>, vector<1x12x20xf32>
    %23 = vector.shape_cast %22 : vector<1x12x20xf32> to vector<12x20xf32>
    %24 = vector.shape_cast %21 : vector<12x20xf32> to vector<1x12x20xf32>
    tpu.vector_store %arg6[%c0_9, %c0_10, %c0_11], %24 {strides = array<i32>} : memref<6x12x20xf32, #tpu.memory_space<vmem>>, vector<1x12x20xf32>,
    %25 = vector.extract_strided_slice %7 {offsets = [16, 0], sizes = [16, 20], strides = [1, 1]} : vector<96x20xbf16> to vector<16x20xbf16>
    %cst_12 = arith.constant dense<0.000000e+00> : vector<12x20xf32>
    %26 = tpu.matmul %3, %25, %cst_12 {dimension_numbers = #tpu.dot_dimension_numbers<[1], [0], [0], [1], [0, 0, 1, 1], [], []>} : vector<12x16xbf16>, vector<16x20xbf16>, vector<12x20xf32> -> vector<12x20xf32>
    %c6_i32_13 = arith.constant 6 : i32
    %27 = arith.muli %arg0, %c6_i32_13 : i32
    %c1_i32 = arith.constant 1 : i32
    %28 = arith.addi %27, %c1_i32 : i32
    %29 = arith.index_cast %28 : i32 to index
    %30 = memref.load %arg1[%29] : memref<6xf32, #tpu.memory_space<smem>>
    %c6_i32_14 = arith.constant 6 : i32
    %31 = arith.muli %arg0, %c6_i32_14 : i32
    %c1_i32_15 = arith.constant 1 : i32
    %32 = arith.addi %31, %c1_i32_15 : i32
    %33 = arith.index_cast %32 : i32 to index
    %34 = memref.load %arg2[%33] : memref<6xf32, #tpu.memory_space<smem>>
    %35 = vector.broadcast %30 : f32 to vector<12x20xf32>
    %36 = arith.mulf %26, %35 : vector<12x20xf32>
    %37 = vector.broadcast %34 : f32 to vector<12x20xf32>
    %38 = arith.addf %36, %37 : vector<12x20xf32>
    %c1 = arith.constant 1 : index
    %c0_16 = arith.constant 0 : index
    %c0_17 = arith.constant 0 : index
    %39 = vector.load %arg6[%c1, %c0_16, %c0_17] : memref<6x12x20xf32, #tpu.memory_space<vmem>>, vector<1x12x20xf32>
    %40 = vector.shape_cast %39 : vector<1x12x20xf32> to vector<12x20xf32>
    %41 = vector.shape_cast %38 : vector<12x20xf32> to vector<1x12x20xf32>
    tpu.vector_store %arg6[%c1, %c0_16, %c0_17], %41 {strides = array<i32>} : memref<6x12x20xf32, #tpu.memory_space<vmem>>, vector<1x12x20xf32>,
    %42 = vector.extract_strided_slice %7 {offsets = [32, 0], sizes = [16, 20], strides = [1, 1]} : vector<96x20xbf16> to vector<16x20xbf16>
    %cst_18 = arith.constant dense<0.000000e+00> : vector<12x20xf32>
    %43 = tpu.matmul %3, %42, %cst_18 {dimension_numbers = #tpu.dot_dimension_numbers<[1], [0], [0], [1], [0, 0, 1, 1], [], []>} : vector<12x16xbf16>, vector<16x20xbf16>, vector<12x20xf32> -> vector<12x20xf32>
    %c6_i32_19 = arith.constant 6 : i32
    %44 = arith.muli %arg0, %c6_i32_19 : i32
    %c2_i32 = arith.constant 2 : i32
    %45 = arith.addi %44, %c2_i32 : i32
    %46 = arith.index_cast %45 : i32 to index
    %47 = memref.load %arg1[%46] : memref<6xf32, #tpu.memory_space<smem>>
    %c6_i32_20 = arith.constant 6 : i32
    %48 = arith.muli %arg0, %c6_i32_20 : i32
    %c2_i32_21 = arith.constant 2 : i32
    %49 = arith.addi %48, %c2_i32_21 : i32
    %50 = arith.index_cast %49 : i32 to index
    %51 = memref.load %arg2[%50] : memref<6xf32, #tpu.memory_space<smem>>
    %52 = vector.broadcast %47 : f32 to vector<12x20xf32>
    %53 = arith.mulf %43, %52 : vector<12x20xf32>
    %54 = vector.broadcast %51 : f32 to vector<12x20xf32>
    %55 = arith.addf %53, %54 : vector<12x20xf32>
    %c2 = arith.constant 2 : index
    %c0_22 = arith.constant 0 : index
    %c0_23 = arith.constant 0 : index
    %56 = vector.load %arg6[%c2, %c0_22, %c0_23] : memref<6x12x20xf32, #tpu.memory_space<vmem>>, vector<1x12x20xf32>
    %57 = vector.shape_cast %56 : vector<1x12x20xf32> to vector<12x20xf32>
    %58 = vector.shape_cast %55 : vector<12x20xf32> to vector<1x12x20xf32>
    tpu.vector_store %arg6[%c2, %c0_22, %c0_23], %58 {strides = array<i32>} : memref<6x12x20xf32, #tpu.memory_space<vmem>>, vector<1x12x20xf32>,
    %59 = vector.extract_strided_slice %7 {offsets = [48, 0], sizes = [16, 20], strides = [1, 1]} : vector<96x20xbf16> to vector<16x20xbf16>
    %cst_24 = arith.constant dense<0.000000e+00> : vector<12x20xf32>
    %60 = tpu.matmul %3, %59, %cst_24 {dimension_numbers = #tpu.dot_dimension_numbers<[1], [0], [0], [1], [0, 0, 1, 1], [], []>} : vector<12x16xbf16>, vector<16x20xbf16>, vector<12x20xf32> -> vector<12x20xf32>
    %c6_i32_25 = arith.constant 6 : i32
    %61 = arith.muli %arg0, %c6_i32_25 : i32
    %c3_i32 = arith.constant 3 : i32
    %62 = arith.addi %61, %c3_i32 : i32
    %63 = arith.index_cast %62 : i32 to index
    %64 = memref.load %arg1[%63] : memref<6xf32, #tpu.memory_space<smem>>
    %c6_i32_26 = arith.constant 6 : i32
    %65 = arith.muli %arg0, %c6_i32_26 : i32
    %c3_i32_27 = arith.constant 3 : i32
    %66 = arith.addi %65, %c3_i32_27 : i32
    %67 = arith.index_cast %66 : i32 to index
    %68 = memref.load %arg2[%67] : memref<6xf32, #tpu.memory_space<smem>>
    %69 = vector.broadcast %64 : f32 to vector<12x20xf32>
    %70 = arith.mulf %60, %69 : vector<12x20xf32>
    %71 = vector.broadcast %68 : f32 to vector<12x20xf32>
    %72 = arith.addf %70, %71 : vector<12x20xf32>
    %c3 = arith.constant 3 : index
    %c0_28 = arith.constant 0 : index
    %c0_29 = arith.constant 0 : index
    %73 = vector.load %arg6[%c3, %c0_28, %c0_29] : memref<6x12x20xf32, #tpu.memory_space<vmem>>, vector<1x12x20xf32>
    %74 = vector.shape_cast %73 : vector<1x12x20xf32> to vector<12x20xf32>
    %75 = vector.shape_cast %72 : vector<12x20xf32> to vector<1x12x20xf32>
    tpu.vector_store %arg6[%c3, %c0_28, %c0_29], %75 {strides = array<i32>} : memref<6x12x20xf32, #tpu.memory_space<vmem>>, vector<1x12x20xf32>,
    %76 = vector.extract_strided_slice %7 {offsets = [64, 0], sizes = [16, 20], strides = [1, 1]} : vector<96x20xbf16> to vector<16x20xbf16>
    %cst_30 = arith.constant dense<0.000000e+00> : vector<12x20xf32>
    %77 = tpu.matmul %3, %76, %cst_30 {dimension_numbers = #tpu.dot_dimension_numbers<[1], [0], [0], [1], [0, 0, 1, 1], [], []>} : vector<12x16xbf16>, vector<16x20xbf16>, vector<12x20xf32> -> vector<12x20xf32>
    %c6_i32_31 = arith.constant 6 : i32
    %78 = arith.muli %arg0, %c6_i32_31 : i32
    %c4_i32 = arith.constant 4 : i32
    %79 = arith.addi %78, %c4_i32 : i32
    %80 = arith.index_cast %79 : i32 to index
    %81 = memref.load %arg1[%80] : memref<6xf32, #tpu.memory_space<smem>>
    %c6_i32_32 = arith.constant 6 : i32
    %82 = arith.muli %arg0, %c6_i32_32 : i32
    %c4_i32_33 = arith.constant 4 : i32
    %83 = arith.addi %82, %c4_i32_33 : i32
    %84 = arith.index_cast %83 : i32 to index
    %85 = memref.load %arg2[%84] : memref<6xf32, #tpu.memory_space<smem>>
    %86 = vector.broadcast %81 : f32 to vector<12x20xf32>
    %87 = arith.mulf %77, %86 : vector<12x20xf32>
    %88 = vector.broadcast %85 : f32 to vector<12x20xf32>
    %89 = arith.addf %87, %88 : vector<12x20xf32>
    %c4 = arith.constant 4 : index
    %c0_34 = arith.constant 0 : index
    %c0_35 = arith.constant 0 : index
    %90 = vector.load %arg6[%c4, %c0_34, %c0_35] : memref<6x12x20xf32, #tpu.memory_space<vmem>>, vector<1x12x20xf32>
    %91 = vector.shape_cast %90 : vector<1x12x20xf32> to vector<12x20xf32>
    %92 = vector.shape_cast %89 : vector<12x20xf32> to vector<1x12x20xf32>
    tpu.vector_store %arg6[%c4, %c0_34, %c0_35], %92 {strides = array<i32>} : memref<6x12x20xf32, #tpu.memory_space<vmem>>, vector<1x12x20xf32>,
    %93 = vector.extract_strided_slice %7 {offsets = [80, 0], sizes = [16, 20], strides = [1, 1]} : vector<96x20xbf16> to vector<16x20xbf16>
    %cst_36 = arith.constant dense<0.000000e+00> : vector<12x20xf32>
    %94 = tpu.matmul %3, %93, %cst_36 {dimension_numbers = #tpu.dot_dimension_numbers<[1], [0], [0], [1], [0, 0, 1, 1], [], []>} : vector<12x16xbf16>, vector<16x20xbf16>, vector<12x20xf32> -> vector<12x20xf32>
    %c6_i32_37 = arith.constant 6 : i32
    %95 = arith.muli %arg0, %c6_i32_37 : i32
    %c5_i32 = arith.constant 5 : i32
    %96 = arith.addi %95, %c5_i32 : i32
    %97 = arith.index_cast %96 : i32 to index
    %98 = memref.load %arg1[%97] : memref<6xf32, #tpu.memory_space<smem>>
    %c6_i32_38 = arith.constant 6 : i32
    %99 = arith.muli %arg0, %c6_i32_38 : i32
    %c5_i32_39 = arith.constant 5 : i32
    %100 = arith.addi %99, %c5_i32_39 : i32
    %101 = arith.index_cast %100 : i32 to index
    %102 = memref.load %arg2[%101] : memref<6xf32, #tpu.memory_space<smem>>
    %103 = vector.broadcast %98 : f32 to vector<12x20xf32>
    %104 = arith.mulf %94, %103 : vector<12x20xf32>
    %105 = vector.broadcast %102 : f32 to vector<12x20xf32>
    %106 = arith.addf %104, %105 : vector<12x20xf32>
    %c5 = arith.constant 5 : index
    %c0_40 = arith.constant 0 : index
    %c0_41 = arith.constant 0 : index
    %107 = vector.load %arg6[%c5, %c0_40, %c0_41] : memref<6x12x20xf32, #tpu.memory_space<vmem>>, vector<1x12x20xf32>
    %108 = vector.shape_cast %107 : vector<1x12x20xf32> to vector<12x20xf32>
    %109 = vector.shape_cast %106 : vector<12x20xf32> to vector<1x12x20xf32>
    tpu.vector_store %arg6[%c5, %c0_40, %c0_41], %109 {strides = array<i32>} : memref<6x12x20xf32, #tpu.memory_space<vmem>>, vector<1x12x20xf32>,
    return
  }
  func.func @transform_0(%arg0: i32, %arg1: memref<6xf32, #tpu.memory_space<smem>>, %arg2: memref<6xf32, #tpu.memory_space<smem>>) -> (i32, i32, i32) {
    %c0_i32 = arith.constant 0 : i32
    %c0_i32_0 = arith.constant 0 : i32
    %c0_i32_1 = arith.constant 0 : i32
    return %arg0, %c0_i32, %c0_i32_0 : i32, i32, i32
  }
  func.func @transform_1(%arg0: i32, %arg1: memref<6xf32, #tpu.memory_space<smem>>, %arg2: memref<6xf32, #tpu.memory_space<smem>>) -> (i32, i32) {
    %c0_i32 = arith.constant 0 : i32
    %c0_i32_0 = arith.constant 0 : i32
    %c0_i32_1 = arith.constant 0 : i32
    return %c0_i32, %c0_i32_0 : i32, i32
  }
  func.func @transform_2(%arg0: i32, %arg1: memref<6xf32, #tpu.memory_space<smem>>, %arg2: memref<6xf32, #tpu.memory_space<smem>>) -> (i32, i32) {
    %c0_i32 = arith.constant 0 : i32
    %c0_i32_0 = arith.constant 0 : i32
    %c0_i32_1 = arith.constant 0 : i32
    return %c0_i32, %c0_i32_0 : i32, i32
  }
  func.func @transform_3(%arg0: i32, %arg1: memref<6xf32, #tpu.memory_space<smem>>, %arg2: memref<6xf32, #tpu.memory_space<smem>>) -> (i32, i32, i32) {
    %c0_i32 = arith.constant 0 : i32
    %c0_i32_0 = arith.constant 0 : i32
    %c0_i32_1 = arith.constant 0 : i32
    return %arg0, %c0_i32, %c0_i32_0 : i32, i32, i32
  }
}

</mosaic_0001>

<bundles_post_ra>
// kernel: tpu_custom_call.1
= control target key start
LH: loop header
LB: loop body
LE: loop exit
PB: predicated region body
PF: predicated region fallthrough
CT: control target
= control target key end

     0   :  { %s805_s18 = smov [#allocation3]   ;;  %s927_s0 = inlined_call_operand.hbm [shape: f32[6], index: 0, kind: input, shape index: {}]   ;;  %s928_s2 = inlined_call_operand.hbm [shape: u8[6,16,16], index: 2, kind: input, shape index: {}]   ;;  %s929_s3 = inlined_call_operand.hbm [shape: bf16[12,16], index: 3, kind: input, shape index: {}]   ;;  %s930_s4 = inlined_call_operand.hbm [shape: bf16[16,20], index: 4, kind: input, shape index: {}]   ;;  %s931_s5 = inlined_call_operand.hbm [shape: f32[6,12,20], index: 5, kind: output, shape index: {}]   ;;  %s932_s1 = inlined_call_operand.vmem [shape: f32[6], index: 1, kind: input, shape index: {}]  }
   0x1   :  { %11 = dma.hbm_to_smem %s927_s0, 16, %s805_s18, [#allocation2] }
   0x2   :  { %s12_s23 = sshll.u32 %s932_s1, 4  ;;  %s13_s23 = int_to_ptr.vmem [resolvable:$true] %s12_s23 }
   0x3   :  { %s705_s24 = scalar_lea.vmem %s13_s23, 16  ;;  %p710_p1 = scmp.lt.s32.totalorder %s13_s23, %s13_s23 }
   0x4   :  { %p706_p0 = scmp.ne.s32.totalorder %s13_s23, %s705_s24  ;;  %p711_p2 = scmp.lt.s32.totalorder %s705_s24, %s705_s24 }
   0x6   :  { %p712_p3 = por %p711_p2, %p710_p1 }
   0x8   :  { %p713_p4 = pnand %p712_p3, %p706_p0 }
   0xa   :  { %716 = shalt.err (!%p713_p4)  }
   0xb   :  { %s806_s25 = smov [#allocation4]  }
   0xc   :  { %15 = dma.vmem_to_smem %s13_s23, 16, %s806_s25, [#allocation2] }
   0xd   :  { %797 = dma.done.wait [#allocation2], 32 }
   0xe   :  { %798 = vsyncadd [#allocation2], 4294967264 }
   0xf   :  { %17 = sfence }
  0x10   :  { %18 = vsyncpa [#allocation6], 0 }
  0x11   :  { %19 = vsyncpa [#allocation9], 0 }
  0x12   :  { %20 = vsyncpa [#allocation7], 0  ;;  %s807_s0 = smov [#allocation8]  }
  0x13   :  { %s38_s26 = sshll.u32 %s807_s0, 4  ;;  %s39_s26 = int_to_ptr.vmem [resolvable:$true] %s38_s26 }
  0x14   :  { %s725_s1 = scalar_lea.vmem %s39_s26, 128  ;;  %p730_p6 = scmp.lt.s32.totalorder %s39_s26, %s39_s26 }
  0x15   :  { %p726_p5 = scmp.ne.s32.totalorder %s39_s26, %s725_s1  ;;  %p731_p7 = scmp.lt.s32.totalorder %s725_s1, %s725_s1 }
  0x17   :  { %p732_p8 = por %p731_p7, %p730_p6 }
  0x19   :  { %p733_p9 = pnand %p732_p8, %p726_p5 }
  0x1b   :  { %736 = shalt.err (!%p733_p9)
}
  0x1c   :  { %s808_s27 = smov 64   ;;  %s809_s28 = smov 4  }
  0x1d   :  { %44 = dma.hbm_to_vmem [thread:$0]  %s929_s3, 128, %s39_s26, [#allocation9], %s808_s27, %s808_s27, %s809_s28  }
  0x1e   :  { %s810_s6 = smov [#allocation5]  }
  0x1f   :  { %s26_s7 = sshll.u32 %s810_s6, 4  ;;  %s27_s7 = int_to_ptr.vmem [resolvable:$true] %s26_s7 }
  0x20   :  { %s745_s8 = scalar_lea.vmem %s27_s7, 384  ;;  %p750_p11 = scmp.lt.s32.totalorder %s27_s7, %s27_s7 }
  0x21   :  { %p746_p10 = scmp.ne.s32.totalorder %s27_s7, %s745_s8  ;;  %p751_p12 = scmp.lt.s32.totalorder %s745_s8, %s745_s8 }
  0x23   :  { %p752_p13 = por %p751_p12, %p750_p11 }
  0x25   :  { %p753_p0 = pnand %p752_p13, %p746_p10 }
  0x27   :  { %756 = shalt.err (!%p753_p0)
}
  0x28   :  { %s811_s9 = smov 32   ;;  %s812_s10 = smov 2  }
  0x29   :  { %32 = dma.hbm_to_vmem [thread:$0]  %s928_s2, 384, %s27_s7, [#allocation6], %s811_s9, %s811_s9, %s812_s10  }
  0x2a   :  { %s813_s13 = smov [#allocation10]  }
  0x2b   :  { %s50_s14 = sshll.u32 %s813_s13, 4  ;;  %s51_s14 = int_to_ptr.vmem [resolvable:$true] %s50_s14 }
  0x2c   :  { %s765_s3 = scalar_lea.vmem %s51_s14, 128  ;;  %p770_p2 = scmp.lt.s32.totalorder %s51_s14, %s51_s14 }
  0x2d   :  { %p766_p1 = scmp.ne.s32.totalorder %s51_s14, %s765_s3  ;;  %p771_p3 = scmp.lt.s32.totalorder %s765_s3, %s765_s3 }
  0x2f   :  { %p772_p4 = por %p771_p3, %p770_p2 }
  0x31   :  { %p773_p5 = pnand %p772_p4, %p766_p1 }
  0x33   :  { %776 = shalt.err (!%p773_p5)
}
  0x34   :  { %56 = dma.hbm_to_vmem [thread:$0]  %s930_s4, 128, %s51_s14, [#allocation9], %s808_s27, %s808_s27, %s809_s28  }
  0x35   :  { %799 = dma.done.wait [#allocation6], 384  }
  0x36   :  { %800 = vsyncadd [#allocation6], 4294966912 }
  0x37   :  { %801 = dma.done.wait [#allocation9], 256  }
  0x38   :  { %802 = vsyncadd [#allocation9], 4294967040  ;;  %v695_v0 = vld [vmem:[#allocation10] sm:$0xff]   ;;  %v71_v8 = vld [vmem:[#allocation5 + $0x8] sm:$0x3]  ;;  %vm131_vm0 = vcmask 130048  }
  0x39   :  { %v67_v1 = vld [vmem:[#allocation5] sm:$0x3]  ;;  %v68_v2 = vld [vmem:[#allocation5 + $0x2] sm:$0x3]  ;;  %v69_v3 = vld [vmem:[#allocation5 + $0x4] sm:$0x3]  ;;  %631 = vmatprep.subr.bf16.mxu0 %v695_v0  ;;  %v83_v11 = vunpack.c.l.u8.bf16 %v71_v8 }
  0x3a   :  { %v79_v4 = vunpack.c.l.u8.bf16 %v67_v1  ;;  %v80_v5 = vunpack.c.l.u8.bf16 %v68_v2  ;;  %v70_v6 = vld [vmem:[#allocation5 + $0x6] sm:$0x3]  ;;  %v81_v7 = vunpack.c.l.u8.bf16 %v69_v3  ;;  %v72_v9 = vld [vmem:[#allocation5 + $0xa] sm:$0x3]  ;;  %632 = vmatpush3.bf16.msra.mxu0 %v695_v0  ;;  %v73_v14 = vld [vmem:[#allocation5 + $0xc] sm:$0x3] }
  0x3b   :  { %v82_v10 = vunpack.c.l.u8.bf16 %v70_v6  ;;  %v84_v12 = vunpack.c.l.u8.bf16 %v72_v9  ;;  %v74_v15 = vld [vmem:[#allocation5 + $0xe] sm:$0x3]  ;;  %v75_v16 = vld [vmem:[#allocation5 + $0x10] sm:$0x3]  ;;  %v76_v19 = vld [vmem:[#allocation5 + $0x12] sm:$0x3]  ;;  %v85_v20 = vunpack.c.l.u8.bf16 %v73_v14 }
  0x3c   :  { %v582_v13 = vcombine.low %v79_v4, %v80_v5  ;;  %v86_v21 = vunpack.c.l.u8.bf16 %v74_v15  ;;  %v87_v22 = vunpack.c.l.u8.bf16 %v75_v16  ;;  %v88_v23 = vunpack.c.l.u8.bf16 %v76_v19  ;;  %v77_v26 = vld [vmem:[#allocation5 + $0x14] sm:$0x3]  ;;  %v78_v27 = vld [vmem:[#allocation5 + $0x16] sm:$0x3]  ;;  %v696_v38 = vld [vmem:[#allocation8] sm:$0x3f]  }
  0x3d   :  { %v583_v17 = vcombine.low %v81_v7, %v82_v10  ;;  %v584_v18 = vcombine.low %v83_v11, %v84_v12  ;;  %v89_v28 = vunpack.c.l.u8.bf16 %v77_v26  ;;  %v90_v29 = vunpack.c.l.u8.bf16 %v78_v27  ;;  %s287_s2 = sld [smem:[#allocation3]]  ;;  %s816_s26 = smov [#allocation11]  }
  0x3e   :  { %633 = vmatprep.mubr.msk.bf16.mxu0 %vm131_vm0, %v582_v13  ;;  %v585_v24 = vcombine.low %v85_v20, %v86_v21  ;;  %v586_v25 = vcombine.low %v87_v22, %v88_v23  ;;  %v814_v31 = vmov 0.0   ;;  %vm815_vm1 = vmmov 0   ;;  %s288_s4 = sld [smem:[#allocation4]]  ;;  %s569_s1 = sshll.u32 %s816_s26, 4  ;;  %s570_s1 = int_to_ptr.vmem [resolvable:$true] %s569_s1 }
  0x3f   :  { %634 = vmatmul.mubr.msk.bf16.vlgmr.msra.gmra.mxu0 %vm131_vm0, %v583_v17  ;;  %v587_v30 = vcombine.low %v89_v28, %v90_v29  ;;  %645 = vmatprep.subr.bf16.mxu1 %v814_v31  ;;  %s882_s17 = sld [smem:[#allocation3 + $0x3]]  ;;  %vm295_vm2 = vcmask 162816   ;;  %vm297_vm3 = vcmask 158720   ;;  %s777_s27 = scalar_lea.vmem %s570_s1, 1536 }
  0x40   :  { %637 = vmatprep.mubr.msk.bf16.mxu0 %vm131_vm0, %v584_v18  ;;  %663 = vmatprep.subr.bf16.mxu0 %v814_v31  ;;  %s884_s18 = sld [smem:[#allocation3 + $0x1]]  ;;  %p778_p6 = scmp.ne.s32.totalorder %s570_s1, %s777_s27 }
  0x41   :  { %647 = vmatprep.mubr.msk.bf16.mxu1 %vm815_vm1, %v814_v31  ;;  %s886_s19 = sld [smem:[#allocation4 + $0x3]]  ;;  %p782_p7 = scmp.lt.s32.totalorder %s570_s1, %s570_s1 }
  0x42   :  { %s888_s20 = sld [smem:[#allocation4 + $0x1]]  ;;  %p783_p8 = scmp.lt.s32.totalorder %s777_s27, %s777_s27 }
  0x43   :  { %v289_v51 = vstv %s287_s2  ;;  %s891_s21 = sld [smem:[#allocation3 + $0x5]] }
  0x44   :  { %v292_v53 = vstv %s288_s4  ;;  %s894_s22 = sld [smem:[#allocation3 + $0x2]]  ;;  %p784_p9 = por %p783_p8, %p782_p7 }
  0x45   :  { %v449_v58 = vstv %s882_s17  ;;  %s898_s23 = sld [smem:[#allocation4 + $0x5]] }
  0x46   :  { %v343_v61 = vstv %s884_s18  ;;  %s901_s24 = sld [smem:[#allocation4 + $0x2]]  ;;  %p785_p10 = pnand %p784_p9, %p778_p6 }
  0x47   :  { %638 = vmatmul.mubr.msk.bf16.gmra.mxu0 %vm131_vm0, %v585_v24  ;;  %v452_v63 = vstv %s886_s19  ;;  %s908_s25 = sld [smem:[#allocation3 + $0x4]] }
  0x48   :  { %641 = vmatprep.mubr.msk.bf16.mxu0 %vm131_vm0, %v586_v25  ;;  %v346_v3 = vstv %s888_s20  ;;  %s913_s0 = sld [smem:[#allocation4 + $0x4]] }
  0x49   :  { %v555_v13 = vstv %s891_s21 }
  0x4a   :  { %v396_v17 = vstv %s894_s22 }
  0x4b   :  { %v558_v19 = vstv %s898_s23 }
  0x4c   :  { %v399_v23 = vstv %s901_s24 }
  0x4f   :  { %642 = vmatmul.mubr.msk.bf16.gmra.mxu0 %vm131_vm0, %v587_v30 }
  0x50   :  { %665 = vmatprep.mubr.msk.bf16.mxu0 %vm815_vm1, %v814_v31 }
  0xff   :  { %v635_v32 = vpop.f32.mrf.mxu0 }
 0x101   :  { %v184_v33 = vpop.f32.mrf.mxu0 }
 0x103   :  { %v636_v34 = vpop.f32.mrf.mxu0 }
 0x104   :  { %v232_v40 = vpack.c.bf16 %v636_v34, %v635_v32 }
 0x105   :  { %v187_v35 = vpop.f32.mrf.mxu0 }
 0x106   :  { %v231_v36 = vpack.c.bf16 %v187_v35, %v184_v33 }
 0x107   :  { %v639_v37 = vpop.f32.mrf.mxu0 }
 0x108   :  { %646 = vmatpush3.bf16.msra.mxu1 %v231_v36  ;;  %v502_v36 = vstv %s908_s25 }
 0x109   :  { %v200_v39 = vpop.f32.mrf.mxu0  ;;  %651 = vmatprep.subr.bf16.mxu1 %v814_v31 }
 0x10b   :  { %v640_v41 = vpop.f32.mrf.mxu0  ;;  %648 = vmatmul.mubr.msk.bf16.vlgmr.msra.gmra.mxu1 %vm131_vm0, %v696_v38 }
 0x10c   :  { %v234_v42 = vpack.c.bf16 %v640_v41, %v639_v37  ;;  %652 = vmatpush3.bf16.msra.mxu1 %v232_v40  ;;  %653 = vmatprep.mubr.msk.bf16.mxu1 %vm815_vm1, %v814_v31 }
 0x10d   :  { %v203_v43 = vpop.f32.mrf.mxu0  ;;  %657 = vmatprep.subr.bf16.mxu1 %v814_v31 }
 0x10e   :  { %664 = vmatpush3.bf16.msra.mxu0 %v234_v42  ;;  %v233_v45 = vpack.c.bf16 %v203_v43, %v200_v39  ;;  %v505_v39 = vstv %s913_s0 }
 0x10f   :  { %v643_v44 = vpop.f32.mrf.mxu0  ;;  %675 = vmatprep.subr.bf16.mxu0 %v814_v31 }
 0x111   :  { %v216_v46 = vpop.f32.mrf.mxu0  ;;  %666 = vmatmul.mubr.msk.bf16.vlgmr.msra.gmra.mxu0 %vm131_vm0, %v696_v38 }
 0x112   :  { %677 = vmatprep.mubr.msk.bf16.mxu0 %vm815_vm1, %v814_v31 }
 0x113   :  { %654 = vmatmul.mubr.msk.bf16.vlgmr.msra.gmra.mxu1 %vm131_vm0, %v696_v38  ;;  %v644_v47 = vpop.f32.mrf.mxu0 }
 0x114   :  { %658 = vmatpush3.bf16.msra.mxu1 %v233_v45  ;;  %v236_v48 = vpack.c.bf16 %v644_v47, %v643_v44  ;;  %659 = vmatprep.mubr.msk.bf16.mxu1 %vm815_vm1, %v814_v31 }
 0x115   :  { %v219_v49 = vpop.f32.mrf.mxu0  ;;  %669 = vmatprep.subr.bf16.mxu1 %v814_v31 }
 0x116   :  { %676 = vmatpush3.bf16.msra.mxu0 %v236_v48  ;;  %v235_v50 = vpack.c.bf16 %v219_v49, %v216_v46 }
 0x119   :  { %678 = vmatmul.mubr.msk.bf16.vlgmr.msra.gmra.mxu0 %vm131_vm0, %v696_v38 }
 0x11b   :  { %660 = vmatmul.mubr.msk.bf16.vlgmr.msra.gmra.mxu1 %vm131_vm0, %v696_v38 }
 0x11c   :  { %670 = vmatpush3.bf16.msra.mxu1 %v235_v50  ;;  %671 = vmatprep.mubr.msk.bf16.mxu1 %vm815_vm1, %v814_v31 }
 0x123   :  { %672 = vmatmul.mubr.msk.bf16.vlgmr.msra.gmra.mxu1 %vm131_vm0, %v696_v38 }
 0x1cb   :  { %v279_v52 = vpop.f32.mrf.mxu1 }
 0x1cc   :  { %v290_v54 = vmul.f32 %v289_v51, %v279_v52 }
 0x1cd   :  { %v649_v55 = vpop.f32.mrf.mxu1 }
 0x1ce   :  { %v293_v56 = vadd.f32 %v292_v53, %v290_v54 }
 0x1cf   :  { %v282_v57 = vpop.f32.mrf.mxu1 }
 0x1d0   :  { %296 = vst.msk [vmem:[#allocation11] sm:$0xff] %vm295_vm2, %v293_v56  ;;  %v291_v59 = vmul.f32 %v289_v51, %v282_v57 }
 0x1d1   :  { %v650_v60 = vpop.f32.mrf.mxu1  ;;  %v439_v62 = vpop.f32.mrf.mxu0 }
 0x1d2   :  { %v294_v0 = vadd.f32 %v292_v53, %v291_v59  ;;  %v450_v1 = vmul.f32 %v449_v58, %v439_v62 }
 0x1d3   :  { %v333_v2 = vpop.f32.mrf.mxu1  ;;  %v667_v4 = vpop.f32.mrf.mxu0 }
 0x1d4   :  { %298 = vst.msk [vmem:[#allocation11 + $0x8] sm:$0xf] %vm297_vm3, %v294_v0  ;;  %v344_v5 = vmul.f32 %v343_v61, %v333_v2  ;;  %v453_v6 = vadd.f32 %v452_v63, %v450_v1 }
 0x1d5   :  { %v655_v7 = vpop.f32.mrf.mxu1  ;;  %v442_v8 = vpop.f32.mrf.mxu0 }
 0x1d6   :  { %v347_v9 = vadd.f32 %v346_v3, %v344_v5  ;;  %456 = vst.msk [vmem:[#allocation11 + $0x30] sm:$0xff] %vm295_vm2, %v453_v6  ;;  %v451_v10 = vmul.f32 %v449_v58, %v442_v8 }
 0x1d7   :  { %v336_v11 = vpop.f32.mrf.mxu1  ;;  %v668_v12 = vpop.f32.mrf.mxu0 }
 0x1d8   :  { %350 = vst.msk [vmem:[#allocation11 + $0x10] sm:$0xff] %vm295_vm2, %v347_v9  ;;  %v345_v14 = vmul.f32 %v343_v61, %v336_v11  ;;  %v454_v15 = vadd.f32 %v452_v63, %v451_v10 }
 0x1d9   :  { %v656_v16 = vpop.f32.mrf.mxu1  ;;  %v545_v18 = vpop.f32.mrf.mxu0 }
 0x1da   :  { %v348_v20 = vadd.f32 %v346_v3, %v345_v14  ;;  %457 = vst.msk [vmem:[#allocation11 + $0x38] sm:$0xf] %vm297_vm3, %v454_v15  ;;  %v556_v21 = vmul.f32 %v555_v13, %v545_v18 }
 0x1db   :  { %v386_v22 = vpop.f32.mrf.mxu1  ;;  %v679_v24 = vpop.f32.mrf.mxu0 }
 0x1dc   :  { %351 = vst.msk [vmem:[#allocation11 + $0x18] sm:$0xf] %vm297_vm3, %v348_v20  ;;  %v397_v25 = vmul.f32 %v396_v17, %v386_v22  ;;  %v559_v26 = vadd.f32 %v558_v19, %v556_v21 }
 0x1dd   :  { %v661_v27 = vpop.f32.mrf.mxu1  ;;  %v548_v28 = vpop.f32.mrf.mxu0 }
 0x1de   :  { %v400_v29 = vadd.f32 %v399_v23, %v397_v25  ;;  %562 = vst.msk [vmem:[#allocation11 + $0x50] sm:$0xff] %vm295_vm2, %v559_v26  ;;  %v557_v30 = vmul.f32 %v555_v13, %v548_v28 }
 0x1df   :  { %v389_v31 = vpop.f32.mrf.mxu1  ;;  %v680_v32 = vpop.f32.mrf.mxu0 }
 0x1e0   :  { %403 = vst.msk [vmem:[#allocation11 + $0x20] sm:$0xff] %vm295_vm2, %v400_v29  ;;  %v398_v33 = vmul.f32 %v396_v17, %v389_v31  ;;  %v560_v34 = vadd.f32 %v558_v19, %v557_v30 }
 0x1e1   :  { %v662_v35 = vpop.f32.mrf.mxu1 }
 0x1e2   :  { %v401_v37 = vadd.f32 %v399_v23, %v398_v33  ;;  %563 = vst.msk [vmem:[#allocation11 + $0x58] sm:$0xf] %vm297_vm3, %v560_v34 }
 0x1e3   :  { %v492_v38 = vpop.f32.mrf.mxu1 }
 0x1e4   :  { %404 = vst.msk [vmem:[#allocation11 + $0x28] sm:$0xf] %vm297_vm3, %v401_v37  ;;  %v503_v40 = vmul.f32 %v502_v36, %v492_v38 }
 0x1e5   :  { %v673_v41 = vpop.f32.mrf.mxu1 }
 0x1e6   :  { %v506_v42 = vadd.f32 %v505_v39, %v503_v40 }
 0x1e7   :  { %v495_v43 = vpop.f32.mrf.mxu1 }
 0x1e8   :  { %509 = vst.msk [vmem:[#allocation11 + $0x40] sm:$0xff] %vm295_vm2, %v506_v42  ;;  %v504_v44 = vmul.f32 %v502_v36, %v495_v43 }
 0x1e9   :  { %v674_v45 = vpop.f32.mrf.mxu1 }
 0x1ea   :  { %v507_v46 = vadd.f32 %v505_v39, %v504_v44 }
 0x1ec   :  { %510 = vst.msk [vmem:[#allocation11 + $0x48] sm:$0xf] %vm297_vm3, %v507_v46 }
 0x1ed   :  { %788 = shalt.err (!%p785_p10)
}
 0x1ee   :  { %s817_s28 = smov 128   ;;  %s818_s29 = smov 8  }
 0x1ef   :  { %575 = dma.vmem_to_hbm [thread:$0]  %s570_s1, 1536, %s931_s5, [#allocation7], %s817_s28, %s817_s28, %s818_s29  }
 0x1f0   :  { %803 = dma.done.wait [#allocation7], 1536  }
 0x1f1   :  { %804 = vsyncadd [#allocation7], 4294965760 }
 0x1f2   :  { %579 = vsyncpa [#allocation6], 1 }
 0x1f3   :  { %580 = vsyncpa [#allocation9], 1 }
 0x1f4   :  { %581 = vsyncpa [#allocation7], 1 }

</bundles_post_ra>
